<compile_context>
chip_gen: v6e
topology: v6e:2x2x1
jax: 0.10.0
libtpu: 0.0.40
codegen_flags: <defaults>
</compile_context>

<pallas_src>
import jax
import jax.numpy as jnp
from jax.experimental import pallas as pl
from jax.experimental.pallas import tpu as pltpu


def _round_up(x, m):
    return ((x + m - 1) // m) * m


def _cdiv(a, b):
    return (a + b - 1) // b


def _vmem_capacity_bytes():
    try:
        info = pltpu.get_tpu_info()
        cap = getattr(info, "vmem_capacity_bytes", None)
        if cap:
            return int(cap)
    except Exception:
        pass
    # Conservative fallback: v7x has 64 MiB per TensorCore.
    return 64 * 1024 * 1024


# ---------------------------------------------------------------------------
# Kernel bodies
# ---------------------------------------------------------------------------

def _ff_kernel_single(x_ref, w1_ref, b1_ref, w2_ref, b2_ref, o_ref):
    # Hidden dim fully resident: one grid axis (M tiles), weights fetched once.
    # x_ref : (tm, E)  input dtype       w1_ref: (E, H)  compute dtype
    # b1_ref: (1, H)   float32           w2_ref: (H, E)  compute dtype
    # b2_ref: (1, E)   float32           o_ref : (tm, E) output dtype
    x = x_ref[...].astype(w1_ref.dtype)          # in-kernel cast (VPU, free-ish)
    h = jnp.dot(x, w1_ref[...], preferred_element_type=jnp.float32)
    h = jnp.maximum(h + b1_ref[...], 0.0)
    y = jnp.dot(h.astype(w2_ref.dtype), w2_ref[...],
                preferred_element_type=jnp.float32)
    o_ref[...] = (y + b2_ref[...]).astype(o_ref.dtype)


def _ff_kernel_multi(x_ref, w1_ref, b1_ref, w2_ref, b2_ref, o_ref, acc_ref):
    # Hidden dim tiled: grid = (M tiles, H tiles); fp32 accumulator over k.
    # x_ref : (tm, E)   w1_ref: (E, th)   b1_ref: (1, th) f32
    # w2_ref: (th, E)   b2_ref: (1, E) f32   acc_ref: (tm, E) f32 scratch
    k = pl.program_id(1)

    x = x_ref[...].astype(w1_ref.dtype)
    h = jnp.dot(x, w1_ref[...], preferred_element_type=jnp.float32)
    h = jnp.maximum(h + b1_ref[...], 0.0)
    partial = jnp.dot(h.astype(w2_ref.dtype), w2_ref[...],
                      preferred_element_type=jnp.float32)

    @pl.when(k == 0)
    def _():
        acc_ref[...] = partial          # write, not zero-init + RMW

    @pl.when(k > 0)
    def _():
        acc_ref[...] += partial

    @pl.when(k == pl.num_programs(1) - 1)
    def _():
        o_ref[...] = (acc_ref[...] + b2_ref[...]).astype(o_ref.dtype)


# ---------------------------------------------------------------------------
# Wrapper
# ---------------------------------------------------------------------------

def feed_forward(x, w1, b1, w2, b2, *, tile_m=1024, tile_h=512,
                 compute_dtype=jnp.bfloat16, pin_weights=None):
    """x: (..., E); w1: (H, E); b1: (H,); w2: (E, H); b2: (E,)  (PyTorch layout).

    compute_dtype: MXU feed dtype (fp32 accumulation always).  Note the bf16
    path also casts the hidden activation back to bf16 before the second
    matmul (standard mixed-precision FFN; extra precision loss vs fp32).
    """
    E = x.shape[-1]
    H = w1.shape[0]
    lead_shape = x.shape[:-1]
    out_dtype = x.dtype

    x2d = x.reshape(-1, E)
    M = x2d.shape[0]

    xb = jnp.dtype(x.dtype).itemsize
    cb = jnp.dtype(compute_dtype).itemsize
    ob = jnp.dtype(out_dtype).itemsize

    # Weight prep: cast (no-op if already compute_dtype) + one transpose to
    # K-major so both in-kernel dots are canonical ((1,),(0,)) contractions.
    w1_t = jnp.transpose(w1.astype(compute_dtype))          # (E, H)
    w2_t = jnp.transpose(w2.astype(compute_dtype))          # (H, E)
    b1_2d = b1.astype(jnp.float32).reshape(1, H)
    b2_2d = b2.astype(jnp.float32).reshape(1, E)

    # ---- VMEM budget (device-derived) -------------------------------------
    vmem_cap = _vmem_capacity_bytes()
    budget = int(0.8 * vmem_cap)

    bias_resident = 2 * 8 * (_round_up(H, 128) + _round_up(E, 128)) * 4
    full_w_resident = 2 * (2 * E * H * cb) + bias_resident  # double-buffered

    if pin_weights is None:
        pin_weights = full_w_resident <= budget // 3

    if pin_weights:
        th = H
        H_pad = H
        kdim = 1
        w_resident = full_w_resident
    else:
        th = min(_round_up(max(tile_h, 128), 128), _round_up(H, 128))
        # Keep double-buffered weight blocks within half the budget.
        while th > 128 and 2 * (2 * E * th * cb) > budget // 2:
            th = max(_round_up(th // 2, 128), 128)
        H_pad = _round_up(H, th)
        kdim = H_pad // th
        w_resident = (2 * (2 * E * th * cb)
                      + 2 * 8 * (_round_up(th, 128) + _round_up(E, 128)) * 4)
        if H_pad != H:
            # Zero-padded hidden units contribute relu(x@0 + 0) @ 0 = 0.
            w1_t = jnp.pad(w1_t, ((0, 0), (0, H_pad - H)))
            w2_t = jnp.pad(w2_t, ((0, H_pad - H), (0, 0)))
            b1_2d = jnp.pad(b1_2d, ((0, 0), (0, H_pad - H)))

    # ---- M tile: as large as the remaining budget allows -------------------
    per_row = 2 * E * xb + 2 * E * ob + (4 * E if kdim > 1 else 0)
    tm_fit = max((budget - w_resident) // max(per_row, 1), 16)
    tm = min(max(tile_m, 16), tm_fit)
    if tm >= M:
        tm = M                                  # block == full dim is always legal
    else:
        tm = max((tm // 16) * 16, 16)           # sublane-packing friendly

    # Small-M / decode: make sure both v7x TensorCores get an M tile when the
    # weights are pinned (no weight re-streaming penalty for splitting).
    if kdim == 1 and M >= 32 and _cdiv(M, tm) == 1:
        half = _round_up((M + 1) // 2, 16)
        if half < M:
            tm = half

    m_tiles = _cdiv(M, tm)

    # ---- vmem limit: 1.5x estimate, capped at 0.85 * device capacity -------
    est = (w_resident + 2 * tm * E * xb + 2 * tm * E * ob
           + (tm * E * 4 if kdim > 1 else 0))
    vmem_limit = min(int(0.85 * vmem_cap),
                     max(int(est * 1.5), 16 * 1024 * 1024))

    # ---- pallas_call --------------------------------------------------------
    if kdim == 1:
        out = pl.pallas_call(
            _ff_kernel_single,
            out_shape=jax.ShapeDtypeStruct((M, E), out_dtype),
            grid_spec=pltpu.PrefetchScalarGridSpec(
                num_scalar_prefetch=0,
                grid=(m_tiles,),
                in_specs=[
                    pl.BlockSpec((tm, E), lambda i: (i, 0)),   # x tile
                    pl.BlockSpec((E, H_pad), lambda i: (0, 0)),  # W1^T (pinned)
                    pl.BlockSpec((1, H_pad), lambda i: (0, 0)),  # b1
                    pl.BlockSpec((H_pad, E), lambda i: (0, 0)),  # W2^T (pinned)
                    pl.BlockSpec((1, E), lambda i: (0, 0)),      # b2
                ],
                out_specs=pl.BlockSpec((tm, E), lambda i: (i, 0)),
            ),
            compiler_params=pltpu.CompilerParams(
                dimension_semantics=("parallel",),
                vmem_limit_bytes=vmem_limit),
        )(x2d, w1_t, b1_2d, w2_t, b2_2d)
    else:
        out = pl.pallas_call(
            _ff_kernel_multi,
            out_shape=jax.ShapeDtypeStruct((M, E), out_dtype),
            grid_spec=pltpu.PrefetchScalarGridSpec(
                num_scalar_prefetch=0,
                grid=(m_tiles, kdim),
                in_specs=[
                    pl.BlockSpec((tm, E), lambda i, k: (i, 0)),   # x (const in k)
                    pl.BlockSpec((E, th), lambda i, k: (0, k)),   # W1^T chunk
                    pl.BlockSpec((1, th), lambda i, k: (0, k)),   # b1 chunk
                    pl.BlockSpec((th, E), lambda i, k: (k, 0)),   # W2^T chunk
                    pl.BlockSpec((1, E), lambda i, k: (0, 0)),    # b2
                ],
                out_specs=pl.BlockSpec((tm, E), lambda i, k: (i, 0)),
                scratch_shapes=[pltpu.VMEM((tm, E), jnp.float32)],
            ),
            compiler_params=pltpu.CompilerParams(
                dimension_semantics=("parallel", "arbitrary"),
                vmem_limit_bytes=vmem_limit),
        )(x2d, w1_t, b1_2d, w2_t, b2_2d)

    return out.reshape(*lead_shape, E)


# ---------------------------------------------------------------------------
# Self-test
# ---------------------------------------------------------------------------

if __name__ == "__main__":
    key = jax.random.PRNGKey(0)
    kx, k1, k2, k3, k4, kx2, k5, k6, k7, k8 = jax.random.split(key, 10)

    # Small shapes consistent with the module: (batch, seq, embedding_dim).
    batch, seq = 2, 8
    embedding_dim, ff_hidden_dim = 32, 64

    x = jax.random.normal(kx, (batch, seq, embedding_dim), dtype=jnp.float32)

    # Deterministic parameter init (PyTorch nn.Linear layout: W is (out, in)).
    lim1 = 1.0 / (embedding_dim ** 0.5)
    lim2 = 1.0 / (ff_hidden_dim ** 0.5)
    w1 = jax.random.uniform(k1, (ff_hidden_dim, embedding_dim),
                            minval=-lim1, maxval=lim1, dtype=jnp.float32)
    b1 = jax.random.uniform(k2, (ff_hidden_dim,),
                            minval=-lim1, maxval=lim1, dtype=jnp.float32)
    w2 = jax.random.uniform(k3, (embedding_dim, ff_hidden_dim),
                            minval=-lim2, maxval=lim2, dtype=jnp.float32)
    b2 = jax.random.uniform(k4, (embedding_dim,),
                            minval=-lim2, maxval=lim2, dtype=jnp.float32)

    ref = jnp.maximum(x @ w1.T + b1, 0.0) @ w2.T + b2

    # 1) Exact-precision path (fp32 compute, weights auto-pinned in VMEM).
    out_f32 = jax.block_until_ready(
        feed_forward(x, w1, b1, w2, b2, compute_dtype=jnp.float32))
    assert out_f32.shape == (batch, seq, embedding_dim)
    assert jnp.allclose(out_f32, ref, atol=1e-4, rtol=1e-4)

    # 2) Default performance path: bf16 MXU feed / fp32 accumulation.
    out_bf16 = jax.block_until_ready(feed_forward(x, w1, b1, w2, b2))
    assert out_bf16.shape == (batch, seq, embedding_dim)
    assert jnp.allclose(out_bf16, ref, atol=5e-2, rtol=5e-2)

    # 3) Tiled-hidden path (forced): exercises the fp32 accumulator over the
    #    "arbitrary" H axis and zero-padding of a ragged hidden dim.
    E2, H2 = 64, 200
    x2 = jax.random.normal(kx2, (batch, seq, E2), dtype=jnp.float32)
    l1 = 1.0 / (E2 ** 0.5)
    l2 = 1.0 / (H2 ** 0.5)
    w1b = jax.random.uniform(k5, (H2, E2), minval=-l1, maxval=l1, dtype=jnp.float32)
    b1b = jax.random.uniform(k6, (H2,), minval=-l1, maxval=l1, dtype=jnp.float32)
    w2b = jax.random.uniform(k7, (E2, H2), minval=-l2, maxval=l2, dtype=jnp.float32)
    b2b = jax.random.uniform(k8, (E2,), minval=-l2, maxval=l2, dtype=jnp.float32)
    ref2 = jnp.maximum(x2 @ w1b.T + b1b, 0.0) @ w2b.T + b2b

    out_multi = jax.block_until_ready(
        feed_forward(x2, w1b, b1b, w2b, b2b, tile_h=128,
                     pin_weights=False, compute_dtype=jnp.float32))
    assert out_multi.shape == (batch, seq, E2)
    assert jnp.allclose(out_multi, ref2, atol=1e-4, rtol=1e-4)

    print("KERNEL_OK")
</pallas_src>

<mosaic_0001>
module attributes {stable_mosaic.version = 11 : i64} {
  func.func @_ff_kernel_single(%arg0: i32, %arg1: memref<16x32xf32, #tpu.memory_space<vmem>>, %arg2: memref<32x64xf32, #tpu.memory_space<vmem>>, %arg3: memref<1x64xf32, #tpu.memory_space<vmem>>, %arg4: memref<64x32xf32, #tpu.memory_space<vmem>>, %arg5: memref<1x32xf32, #tpu.memory_space<vmem>>, %arg6: memref<16x32xf32, #tpu.memory_space<vmem>>) attributes {dimension_semantics = [#tpu.dimension_semantics<parallel>], iteration_bounds = array<i64: 1>, scalar_prefetch = 0 : i64, scratch_operands = 0 : i64, tpu.core_type = #tpu.core_type<tc>, window_params = [{transform_indices = @transform_0, window_bounds = array<i64: 16, 32>}, {pipeline_mode = #tpu.pipeline_mode<synchronous>, transform_indices = @transform_1, window_bounds = array<i64: 32, 64>}, {pipeline_mode = #tpu.pipeline_mode<synchronous>, transform_indices = @transform_2, window_bounds = array<i64: 1, 64>}, {pipeline_mode = #tpu.pipeline_mode<synchronous>, transform_indices = @transform_3, window_bounds = array<i64: 64, 32>}, {pipeline_mode = #tpu.pipeline_mode<synchronous>, transform_indices = @transform_4, window_bounds = array<i64: 1, 32>}, {transform_indices = @transform_5, window_bounds = array<i64: 16, 32>}]} {
    %c0 = arith.constant 0 : index
    %c0_0 = arith.constant 0 : index
    %0 = vector.load %arg1[%c0, %c0_0] : memref<16x32xf32, #tpu.memory_space<vmem>>, vector<16x32xf32>
    %c0_1 = arith.constant 0 : index
    %c0_2 = arith.constant 0 : index
    %1 = vector.load %arg2[%c0_1, %c0_2] : memref<32x64xf32, #tpu.memory_space<vmem>>, vector<32x64xf32>
    %cst = arith.constant dense<0.000000e+00> : vector<16x64xf32>
    %2 = tpu.matmul %0, %1, %cst {dimension_numbers = #tpu.dot_dimension_numbers<[1], [0], [0], [1], [0, 0, 1, 1], [], []>} : vector<16x32xf32>, vector<32x64xf32>, vector<16x64xf32> -> vector<16x64xf32>
    %c0_3 = arith.constant 0 : index
    %c0_4 = arith.constant 0 : index
    %3 = vector.load %arg3[%c0_3, %c0_4] : memref<1x64xf32, #tpu.memory_space<vmem>>, vector<1x64xf32>
    %4 = vector.broadcast %3 : vector<1x64xf32> to vector<16x64xf32>
    %5 = arith.addf %2, %4 : vector<16x64xf32>
    %cst_5 = arith.constant 0.000000e+00 : f32
    %6 = vector.broadcast %cst_5 : f32 to vector<16x64xf32>
    %7 = arith.maximumf %5, %6 : vector<16x64xf32>
    %c0_6 = arith.constant 0 : index
    %c0_7 = arith.constant 0 : index
    %8 = vector.load %arg4[%c0_6, %c0_7] : memref<64x32xf32, #tpu.memory_space<vmem>>, vector<64x32xf32>
    %cst_8 = arith.constant dense<0.000000e+00> : vector<16x32xf32>
    %9 = tpu.matmul %7, %8, %cst_8 {dimension_numbers = #tpu.dot_dimension_numbers<[1], [0], [0], [1], [0, 0, 1, 1], [], []>} : vector<16x64xf32>, vector<64x32xf32>, vector<16x32xf32> -> vector<16x32xf32>
    %c0_9 = arith.constant 0 : index
    %c0_10 = arith.constant 0 : index
    %10 = vector.load %arg5[%c0_9, %c0_10] : memref<1x32xf32, #tpu.memory_space<vmem>>, vector<1x32xf32>
    %11 = vector.broadcast %10 : vector<1x32xf32> to vector<16x32xf32>
    %12 = arith.addf %9, %11 : vector<16x32xf32>
    %c0_11 = arith.constant 0 : index
    %c0_12 = arith.constant 0 : index
    %13 = vector.load %arg6[%c0_11, %c0_12] : memref<16x32xf32, #tpu.memory_space<vmem>>, vector<16x32xf32>
    tpu.vector_store %arg6[%c0_11, %c0_12], %12 {strides = array<i32>} : memref<16x32xf32, #tpu.memory_space<vmem>>, vector<16x32xf32>,
    return
  }
  func.func @transform_0(%arg0: i32) -> (i32, i32) {
    %c0_i32 = arith.constant 0 : i32
    %c0_i32_0 = arith.constant 0 : i32
    return %arg0, %c0_i32 : i32, i32
  }
  func.func @transform_1(%arg0: i32) -> (i32, i32) {
    %c0_i32 = arith.constant 0 : i32
    %c0_i32_0 = arith.constant 0 : i32
    %c0_i32_1 = arith.constant 0 : i32
    return %c0_i32, %c0_i32_0 : i32, i32
  }
  func.func @transform_2(%arg0: i32) -> (i32, i32) {
    %c0_i32 = arith.constant 0 : i32
    %c0_i32_0 = arith.constant 0 : i32
    %c0_i32_1 = arith.constant 0 : i32
    return %c0_i32, %c0_i32_0 : i32, i32
  }
  func.func @transform_3(%arg0: i32) -> (i32, i32) {
    %c0_i32 = arith.constant 0 : i32
    %c0_i32_0 = arith.constant 0 : i32
    %c0_i32_1 = arith.constant 0 : i32
    return %c0_i32, %c0_i32_0 : i32, i32
  }
  func.func @transform_4(%arg0: i32) -> (i32, i32) {
    %c0_i32 = arith.constant 0 : i32
    %c0_i32_0 = arith.constant 0 : i32
    %c0_i32_1 = arith.constant 0 : i32
    return %c0_i32, %c0_i32_0 : i32, i32
  }
  func.func @transform_5(%arg0: i32) -> (i32, i32) {
    %c0_i32 = arith.constant 0 : i32
    %c0_i32_0 = arith.constant 0 : i32
    return %arg0, %c0_i32 : i32, i32
  }
}

</mosaic_0001>

<bundles_post_ra>
// kernel: tpu_custom_call.1
= control target key start
LH: loop header
LB: loop body
LE: loop exit
PB: predicated region body
PF: predicated region fallthrough
CT: control target
= control target key end

     0   :  { %vm34_vm0 = vcmask 261120   ;;  %s398_s0 = inlined_call_operand.vmem [shape: f32[16,32], index: 0, kind: input, shape index: {}]   ;;  %s399_s1 = inlined_call_operand.vmem [shape: f32[32,64], index: 1, kind: input, shape index: {}]   ;;  %s400_s2 = inlined_call_operand.vmem [shape: f32[1,64], index: 2, kind: input, shape index: {}]   ;;  %s401_s3 = inlined_call_operand.vmem [shape: f32[64,32], index: 3, kind: input, shape index: {}]   ;;  %s402_s4 = inlined_call_operand.vmem [shape: f32[1,32], index: 4, kind: input, shape index: {}]   ;;  %s403_s5 = inlined_call_operand.hbm [shape: f32[16,32], index: 5, kind: output, shape index: {}]  }
   0x1   :  { %v26_v0 = vld [vmem:[%s399_s1 + $0x18] sm:$0xff]  ;;  %v25_v1 = vld [vmem:[%s399_s1 + $0x10] sm:$0xff]  ;;  %v21_v2 = vld [vmem:[%s398_s0] sm:$0xff] }
   0x2   :  { %255 = vmatprep.subr.mxu0 %v26_v0  ;;  %v24_v3 = vld [vmem:[%s399_s1 + $0x8] sm:$0xff]  ;;  %263 = vmatprep.mubr.msk.f32.mxu0 %vm34_vm0, %v21_v2  ;;  %v125_v4 = vld [vmem:[%s401_s3 + $0x38] sm:$0xff]  ;;  %v124_v5 = vld [vmem:[%s401_s3 + $0x30] sm:$0xff] }
   0x3   :  { %256 = vmatpush3.msra.mxu0 %v26_v0  ;;  %266 = vmatprep.subr.mxu1 %v125_v4 }
   0x4   :  { %257 = vmatprep.subr.mxu0 %v25_v1 }
   0x5   :  { %10 = vsyncpa [#allocation3], 0  ;;  %258 = vmatpush3.msra.mxu0 %v25_v1  ;;  %v23_v6 = vld [vmem:[%s399_s1] sm:$0xff]  ;;  %267 = vmatpush3.msra.mxu1 %v125_v4  ;;  %v123_v7 = vld [vmem:[%s401_s3 + $0x28] sm:$0xff]  ;;  %vm133_vm1 = vcmask 523264  }
   0x6   :  { %259 = vmatprep.subr.mxu0 %v24_v3  ;;  %268 = vmatprep.subr.mxu1 %v124_v5  ;;  %v22_v8 = vld [vmem:[%s398_s0 + $0x8] sm:$0xff]  ;;  %v122_v9 = vld [vmem:[%s401_s3 + $0x20] sm:$0xff]  ;;  %v121_v10 = vld [vmem:[%s401_s3 + $0x18] sm:$0xff] }
   0x7   :  { %260 = vmatpush3.msra.mxu0 %v24_v3  ;;  %269 = vmatpush3.msra.mxu1 %v124_v5  ;;  %v120_v11 = vld [vmem:[%s401_s3 + $0x10] sm:$0xff]  ;;  %v119_v12 = vld [vmem:[%s401_s3 + $0x8] sm:$0xff]  ;;  %v118_v13 = vld [vmem:[%s401_s3] sm:$0xff]  ;;  %s310_s3 = smov [#allocation2]  }
   0x8   :  { %261 = vmatprep.subr.mxu0 %v23_v6  ;;  %270 = vmatprep.subr.mxu1 %v123_v7  ;;  %v233_v14 = vld [vmem:[%s400_s2] ss:$0 sm:$0xff]  ;;  %s222_s23 = sshll.u32 %s310_s3, 4  ;;  %s223_s23 = int_to_ptr.vmem [resolvable:$true] %s222_s23 }
   0x9   :  { %262 = vmatpush3.msra.mxu0 %v23_v6  ;;  %271 = vmatpush3.msra.mxu1 %v123_v7  ;;  %v236_v21 = vld [vmem:[%s402_s4] ss:$0 sm:$0xff]  ;;  %s288_s2 = scalar_lea.vmem %s223_s23, 256  ;;  %p293_p1 = scmp.lt.s32.totalorder %s223_s23, %s223_s23 }
   0xa   :  { %264 = vmatmul.mubr.msk.f32.vlgmr.msra.gmra.mxu0 %vm34_vm0, %v22_v8  ;;  %272 = vmatprep.subr.mxu1 %v122_v9  ;;  %p289_p0 = scmp.ne.s32.totalorder %s223_s23, %s288_s2  ;;  %p294_p2 = scmp.lt.s32.totalorder %s288_s2, %s288_s2 }
   0xb   :  { %273 = vmatpush3.msra.mxu1 %v122_v9 }
   0xc   :  { %274 = vmatprep.subr.mxu1 %v121_v10  ;;  %p295_p3 = por %p294_p2, %p293_p1 }
   0xd   :  { %275 = vmatpush3.msra.mxu1 %v121_v10 }
   0xe   :  { %276 = vmatprep.subr.mxu1 %v120_v11  ;;  %p296_p4 = pnand %p295_p3, %p289_p0 }
   0xf   :  { %277 = vmatpush3.msra.mxu1 %v120_v11 }
  0x10   :  { %278 = vmatprep.subr.mxu1 %v119_v12 }
  0x11   :  { %279 = vmatpush3.msra.mxu1 %v119_v12 }
  0x12   :  { %280 = vmatprep.subr.mxu1 %v118_v13 }
  0x13   :  { %281 = vmatpush3.msra.mxu1 %v118_v13 }
  0xca   :  { %v265_v15 = vpop.f32.mrf.mxu0 }
  0xcb   :  { %v113_v16 = vadd.f32 %v265_v15, %v233_v14 }
  0xcc   :  { %v107_v17 = vpop.f32.mrf.mxu0 }
  0xcd   :  { %v108_v18 = vadd.f32 %v233_v14, %v107_v17  ;;  %v117_v20 = vmax.f32 %v113_v16, 0.0 }
  0xcf   :  { %v116_v19 = vmax.f32 %v108_v18, 0.0 }
  0xd1   :  { %282 = vmatprep.mubr.msk.f32.mxu1 %vm133_vm1, %v116_v19 }
  0xd2   :  { %283 = vmatmul.mubr.msk.f32.vlgmr.msra.gmra.mxu1 %vm133_vm1, %v117_v20 }
 0x192   :  { %v284_v22 = vpop.f32.mrf.mxu1 }
 0x193   :  { %v212_v23 = vadd.f32 %v284_v22, %v236_v21 }
 0x194   :  { %v206_v24 = vpop.f32.mrf.mxu1 }
 0x195   :  { %216 = vst.msk [vmem:[#allocation2 + $0x8] sm:$0xff] %vm34_vm0, %v212_v23  ;;  %v207_v25 = vadd.f32 %v236_v21, %v206_v24 }
 0x197   :  { %215 = vst.msk [vmem:[#allocation2] sm:$0xff] %vm34_vm0, %v207_v25 }
 0x198   :  { %299 = shalt.err (!%p296_p4)
}
 0x199   :  { %s311_s24 = smov 128   ;;  %s312_s4 = smov 8  }
 0x19a   :  { %228 = dma.vmem_to_hbm [thread:$0]  %s223_s23, 256, %s403_s5, [#allocation3], %s311_s24, %s311_s24, %s312_s4  }
 0x19b   :  { %308 = dma.done.wait [#allocation3], 256  }
 0x19c   :  { %309 = vsyncadd [#allocation3], 4294967040 }
 0x19d   :  { %232 = vsyncpa [#allocation3], 1 }

</bundles_post_ra>
